<compile_context>
chip_gen: v7x
topology: tpu7x:2x2x1
jax: 0.10.0
libtpu: 0.0.40
codegen_flags: <defaults>
</compile_context>

<pallas_src>
import functools

import numpy as np
import jax
import jax.numpy as jnp
from jax.experimental import pallas as pl
from jax.experimental.pallas import tpu as pltpu


def _quanv_kernel(x_ref, o_ref, *, nq, kk, u_rows, half_pi):
    """One lane-tile of patches through the simulated quantum circuit.

    x_ref: (kk, TP)  patch pixels (pixel index on sublanes, patch index on lanes)
    o_ref: (nq, TP)  <Z_q> expectation values
    u_rows: nested tuple of Python floats, the (dim, dim) circuit unitary U
            baked in as compile-time scalar constants.
    """
    dim = 1 << nq
    x = x_ref[...]                                   # (kk, TP)

    # Cumulative RY half-angle per qubit (pixel i encodes on qubit i % nq; RY
    # angles on the same qubit add), computed as unrolled row adds + one scalar
    # multiply per qubit.  cos/sin hit the EUP once per qubit on full-lane rows.
    c_rows, s_rows = [], []
    for q in range(nq):
        rows = [x[i:i + 1, :] for i in range(kk) if i % nq == q]
        if rows:
            acc = rows[0]
            for r in rows[1:]:
                acc = acc + r
            half = acc * half_pi
        else:
            half = jnp.zeros_like(x[0:1, :])
        c_rows.append(jnp.cos(half))                 # (1, TP)
        s_rows.append(jnp.sin(half))                 # (1, TP)

    # Product-state amplitudes psi_b = prod_q (sin if bit_q(b) else cos).
    psi = []
    for b in range(dim):
        amp = None
        for q in range(nq):
            term = s_rows[q] if ((b >> q) & 1) else c_rows[q]
            amp = term if amp is None else amp * term
        psi.append(amp)                              # (1, TP)

    # phi_b = sum_j U[b, j] * psi_j with baked scalar coefficients (VPU
    # scalar-broadcast MACs, no MXU); <Z_q> = sum_b (+/-1) * phi_b^2 accumulated
    # directly so the probability matrix is never materialized.
    out_rows = [None] * nq
    for b in range(dim):
        phi_b = None
        for j in range(dim):
            coeff = u_rows[b][j]
            if coeff == 0.0:
                continue
            term = psi[j] * coeff
            phi_b = term if phi_b is None else phi_b + term
        p_b = phi_b * phi_b                          # (1, TP)
        for q in range(nq):
            if ((b >> q) & 1) == 0:
                out_rows[q] = p_b if out_rows[q] is None else out_rows[q] + p_b
            else:
                out_rows[q] = -p_b if out_rows[q] is None else out_rows[q] - p_b

    o_ref[...] = jnp.concatenate(out_rows, axis=0)   # (nq, TP), full-lane store


def _choose_tile_p(P, target=8192):
    """Pick a lane-tile size (multiple of 128) that divides P when possible (so no
    host-side pad pass is needed) and leaves >= 2 grid steps when P allows, so the
    grid shards across both v7x TensorCores instead of collapsing to grid=1."""
    cap = max(128, min(target, ((P // 2) // 128) * 128))
    for t in range(cap, 0, -128):
        if P % t == 0:
            return t
    return cap


def _quanv_layer(x, u_rows, kernel_size, nq, target_tile=8192):
    """One QuantumConvolutionLayer.  x: (N, C, H, W) f32 -> (N, C*nq, H//kh, W//kw)."""
    N, C, H, W = x.shape
    kh, kw = kernel_size
    Ho, Wo = H // kh, W // kw
    kk = kh * kw

    # ---- patch extraction in lane-dense layout: (kk, P) with P = N*C*Ho*Wo ----
    # TODO(synk): the single XLA transpose here (and the small output transpose
    # below) could be folded into the BlockSpec index_map to save an HBM pass.
    patches = x[:, :, : Ho * kh, : Wo * kw].reshape(N, C, Ho, kh, Wo, kw)
    patches = patches.transpose(3, 5, 0, 1, 2, 4).reshape(kk, -1)   # (kk, P)
    P = patches.shape[1]

    tile_p = _choose_tile_p(P, target_tile)
    P_pad = pl.cdiv(P, tile_p) * tile_p
    if P_pad != P:
        # TODO(synk): handle the ragged last tile with a masked store instead of padding.
        patches = jnp.pad(patches, ((0, 0), (0, P_pad - P)))

    grid = (P_pad // tile_p,)
    out = pl.pallas_call(
        functools.partial(_quanv_kernel, nq=nq, kk=kk, u_rows=u_rows,
                          half_pi=float(np.pi * 0.5)),
        out_shape=jax.ShapeDtypeStruct((nq, P_pad), jnp.float32),
        grid_spec=pltpu.PrefetchScalarGridSpec(
            num_scalar_prefetch=0,
            grid=grid,
            in_specs=[pl.BlockSpec((kk, tile_p), lambda i: (0, i))],
            out_specs=pl.BlockSpec((nq, tile_p), lambda i: (0, i)),
        ),
        compiler_params=pltpu.CompilerParams(
            dimension_semantics=("parallel",)),
    )(patches)

    out = out[:, :P].reshape(nq, N, C, Ho, Wo)
    out = out.transpose(1, 2, 0, 3, 4).reshape(N, C * nq, Ho, Wo)
    return out


def _quanv_reference(x, u_mats, kernel_size, nq):
    """Pure-JAX reference (same math, original (P, kk) layout) for verification."""
    kh, kw = kernel_size
    dim = 2 ** nq
    for u in u_mats:
        N, C, H, W = x.shape
        Ho, Wo = H // kh, W // kw
        kk = kh * kw
        p = x[:, :, : Ho * kh, : Wo * kw].reshape(N, C, Ho, kh, Wo, kw)
        p = p.transpose(0, 1, 2, 4, 3, 5).reshape(-1, kk)            # (P, kk)
        a = np.zeros((kk, nq), np.float32)
        for i in range(kk):
            a[i, i % nq] = 1.0
        half = 0.5 * jnp.pi * (p @ jnp.asarray(a))                   # (P, nq)
        c, s = jnp.cos(half), jnp.sin(half)
        cols = []
        for b in range(dim):
            amp = jnp.ones((p.shape[0],), jnp.float32)
            for q in range(nq):
                amp = amp * (s[:, q] if ((b >> q) & 1) else c[:, q])
            cols.append(amp)
        psi = jnp.stack(cols, axis=-1)                               # (P, dim)
        phi = psi @ jnp.asarray(u.T)                                 # (P, dim)
        probs = phi * phi
        sgn = np.array([[1.0 if ((b >> q) & 1) == 0 else -1.0 for q in range(nq)]
                        for b in range(dim)], np.float32)
        out = probs @ jnp.asarray(sgn)                               # (P, nq)
        x = out.reshape(N, C, Ho, Wo, nq).transpose(0, 1, 4, 2, 3)
        x = x.reshape(N, C * nq, Ho, Wo)
    return x


class QuantumBackbone:
    """JAX/Pallas re-implementation of Modules.backbones.QuantumBackbone."""

    # TODO(synk): QuantumConvolutionLayer's source isn't provided; this uses the
    # canonical quanvolution definition (RY angle encoding + fixed deterministic
    # circuit unitary + Pauli-Z expectations), simulated classically in-kernel.
    # TODO(synk): for nb_q_conv_layer > 1 the layers are chained through HBM
    # (re-patching between layers requires a data reshuffle); fusing consecutive
    # layers into one pallas_call is a possible further optimization.

    def __init__(self, input_shape, output_shape=None, **hp):
        self.hp = hp
        self.input_shape = input_shape
        self.kernel_size = tuple(hp.get("kernel_size", (2, 2)))
        self.nb_qubits = int(hp.get("nb_qubits", 2))
        self.nb_layers = int(hp.get("nb_q_conv_layer", 1))

        # deterministic fixed circuit unitary per layer (real orthogonal dim x dim)
        dim = 2 ** self.nb_qubits
        self.unitaries = []       # numpy matrices (for the reference check)
        self._u_rows = []         # nested float tuples, baked into the kernel
        for layer in range(self.nb_layers):
            rng = np.random.default_rng(1234 + layer)
            m = rng.standard_normal((dim, dim)).astype(np.float32)
            q_mat, _ = np.linalg.qr(m)
            q_mat = q_mat.astype(np.float32)
            self.unitaries.append(q_mat)
            self._u_rows.append(tuple(tuple(float(v) for v in row) for row in q_mat))

    def __call__(self, x):
        return self.forward(x)

    def forward(self, x):
        x = x.astype(jnp.float32)
        for u_rows in self._u_rows:
            x = _quanv_layer(x, u_rows, self.kernel_size, self.nb_qubits)
        return x

    def get_output_shape(self):
        ones = jnp.ones((1, *self.input_shape), dtype=jnp.float32)
        return self(ones).shape


if __name__ == "__main__":
    key = jax.random.PRNGKey(0)
    # small NCHW input consistent with a quanvolution backbone
    x = jax.random.uniform(key, (2, 4, 16, 16), dtype=jnp.float32)

    model = QuantumBackbone(
        input_shape=(4, 16, 16),
        kernel_size=(2, 2),
        nb_qubits=2,
        nb_q_conv_layer=2,
    )

    y = model(x)
    jax.block_until_ready(y)

    # each layer: C *= nb_qubits, spatial halved by the (2,2) quantum conv
    assert y.shape == (2, 16, 4, 4), y.shape

    # pure-JAX reference check
    y_ref = _quanv_reference(x, model.unitaries, model.kernel_size, model.nb_qubits)
    err = float(jnp.max(jnp.abs(y - y_ref)))
    assert err < 1e-4, err

    assert model.get_output_shape() == (1, 16, 4, 4)
    print("KERNEL_OK")
</pallas_src>

<mosaic_0001>
module attributes {stable_mosaic.version = 11 : i64} {
  func.func @_quanv_kernel(%arg0: i32, %arg1: memref<4x256xf32, #tpu.memory_space<vmem>>, %arg2: memref<2x256xf32, #tpu.memory_space<vmem>>) attributes {dimension_semantics = [#tpu.dimension_semantics<parallel>], iteration_bounds = array<i64: 2>, scalar_prefetch = 0 : i64, scratch_operands = 0 : i64, tpu.core_type = #tpu.core_type<tc>, window_params = [{transform_indices = @transform_0, window_bounds = array<i64: 4, 256>}, {transform_indices = @transform_1, window_bounds = array<i64: 2, 256>}]} {
    %c0 = arith.constant 0 : index
    %c0_0 = arith.constant 0 : index
    %0 = vector.load %arg1[%c0, %c0_0] : memref<4x256xf32, #tpu.memory_space<vmem>>, vector<4x256xf32>
    %1 = vector.extract_strided_slice %0 {offsets = [0, 0], sizes = [1, 256], strides = [1, 1]} : vector<4x256xf32> to vector<1x256xf32>
    %2 = vector.extract_strided_slice %0 {offsets = [2, 0], sizes = [1, 256], strides = [1, 1]} : vector<4x256xf32> to vector<1x256xf32>
    %3 = arith.addf %1, %2 : vector<1x256xf32>
    %cst = arith.constant 1.57079637 : f32
    %4 = vector.broadcast %cst : f32 to vector<1x256xf32>
    %5 = arith.mulf %3, %4 : vector<1x256xf32>
    %6 = math.cos %5 : vector<1x256xf32>
    %7 = math.sin %5 : vector<1x256xf32>
    %8 = vector.extract_strided_slice %0 {offsets = [1, 0], sizes = [1, 256], strides = [1, 1]} : vector<4x256xf32> to vector<1x256xf32>
    %9 = vector.extract_strided_slice %0 {offsets = [3, 0], sizes = [1, 256], strides = [1, 1]} : vector<4x256xf32> to vector<1x256xf32>
    %10 = arith.addf %8, %9 : vector<1x256xf32>
    %cst_1 = arith.constant 1.57079637 : f32
    %11 = vector.broadcast %cst_1 : f32 to vector<1x256xf32>
    %12 = arith.mulf %10, %11 : vector<1x256xf32>
    %13 = math.cos %12 : vector<1x256xf32>
    %14 = math.sin %12 : vector<1x256xf32>
    %15 = arith.mulf %6, %13 : vector<1x256xf32>
    %16 = arith.mulf %7, %13 : vector<1x256xf32>
    %17 = arith.mulf %6, %14 : vector<1x256xf32>
    %18 = arith.mulf %7, %14 : vector<1x256xf32>
    %cst_2 = arith.constant -0.613491952 : f32
    %19 = vector.broadcast %cst_2 : f32 to vector<1x256xf32>
    %20 = arith.mulf %15, %19 : vector<1x256xf32>
    %cst_3 = arith.constant -0.133432776 : f32
    %21 = vector.broadcast %cst_3 : f32 to vector<1x256xf32>
    %22 = arith.mulf %16, %21 : vector<1x256xf32>
    %23 = arith.addf %20, %22 : vector<1x256xf32>
    %cst_4 = arith.constant 0.654917061 : f32
    %24 = vector.broadcast %cst_4 : f32 to vector<1x256xf32>
    %25 = arith.mulf %17, %24 : vector<1x256xf32>
    %26 = arith.addf %23, %25 : vector<1x256xf32>
    %cst_5 = arith.constant 0.420603156 : f32
    %27 = vector.broadcast %cst_5 : f32 to vector<1x256xf32>
    %28 = arith.mulf %18, %27 : vector<1x256xf32>
    %29 = arith.addf %26, %28 : vector<1x256xf32>
    %30 = arith.mulf %29, %29 : vector<1x256xf32>
    %cst_6 = arith.constant 0.330395162 : f32
    %31 = vector.broadcast %cst_6 : f32 to vector<1x256xf32>
    %32 = arith.mulf %15, %31 : vector<1x256xf32>
    %cst_7 = arith.constant -0.933616877 : f32
    %33 = vector.broadcast %cst_7 : f32 to vector<1x256xf32>
    %34 = arith.mulf %16, %33 : vector<1x256xf32>
    %35 = arith.addf %32, %34 : vector<1x256xf32>
    %cst_8 = arith.constant 0.136070505 : f32
    %36 = vector.broadcast %cst_8 : f32 to vector<1x256xf32>
    %37 = arith.mulf %17, %36 : vector<1x256xf32>
    %38 = arith.addf %35, %37 : vector<1x256xf32>
    %cst_9 = arith.constant -0.0261415802 : f32
    %39 = vector.broadcast %cst_9 : f32 to vector<1x256xf32>
    %40 = arith.mulf %18, %39 : vector<1x256xf32>
    %41 = arith.addf %38, %40 : vector<1x256xf32>
    %42 = arith.mulf %41, %41 : vector<1x256xf32>
    %43 = arith.subf %30, %42 : vector<1x256xf32>
    %44 = arith.addf %30, %42 : vector<1x256xf32>
    %cst_10 = arith.constant -0.637322127 : f32
    %45 = vector.broadcast %cst_10 : f32 to vector<1x256xf32>
    %46 = arith.mulf %15, %45 : vector<1x256xf32>
    %cst_11 = arith.constant -0.233157381 : f32
    %47 = vector.broadcast %cst_11 : f32 to vector<1x256xf32>
    %48 = arith.mulf %16, %47 : vector<1x256xf32>
    %49 = arith.addf %46, %48 : vector<1x256xf32>
    %cst_12 = arith.constant -0.188636735 : f32
    %50 = vector.broadcast %cst_12 : f32 to vector<1x256xf32>
    %51 = arith.mulf %17, %50 : vector<1x256xf32>
    %52 = arith.addf %49, %51 : vector<1x256xf32>
    %cst_13 = arith.constant -0.709841072 : f32
    %53 = vector.broadcast %cst_13 : f32 to vector<1x256xf32>
    %54 = arith.mulf %18, %53 : vector<1x256xf32>
    %55 = arith.addf %52, %54 : vector<1x256xf32>
    %56 = arith.mulf %55, %55 : vector<1x256xf32>
    %57 = arith.addf %43, %56 : vector<1x256xf32>
    %58 = arith.subf %44, %56 : vector<1x256xf32>
    %cst_14 = arith.constant -0.32907024 : f32
    %59 = vector.broadcast %cst_14 : f32 to vector<1x256xf32>
    %60 = arith.mulf %15, %59 : vector<1x256xf32>
    %cst_15 = arith.constant -0.237050325 : f32
    %61 = vector.broadcast %cst_15 : f32 to vector<1x256xf32>
    %62 = arith.mulf %16, %61 : vector<1x256xf32>
    %63 = arith.addf %60, %62 : vector<1x256xf32>
    %cst_16 = arith.constant -0.719016433 : f32
    %64 = vector.broadcast %cst_16 : f32 to vector<1x256xf32>
    %65 = arith.mulf %17, %64 : vector<1x256xf32>
    %66 = arith.addf %63, %65 : vector<1x256xf32>
    %cst_17 = arith.constant 0.564389288 : f32
    %67 = vector.broadcast %cst_17 : f32 to vector<1x256xf32>
    %68 = arith.mulf %18, %67 : vector<1x256xf32>
    %69 = arith.addf %66, %68 : vector<1x256xf32>
    %70 = arith.mulf %69, %69 : vector<1x256xf32>
    %71 = arith.subf %57, %70 : vector<1x256xf32>
    %72 = arith.subf %58, %70 : vector<1x256xf32>
    %73 = tpu.concatenate %71, %72 in 0 : vector<1x256xf32>, vector<1x256xf32> -> vector<2x256xf32>
    %c0_18 = arith.constant 0 : index
    %c0_19 = arith.constant 0 : index
    %74 = vector.load %arg2[%c0_18, %c0_19] : memref<2x256xf32, #tpu.memory_space<vmem>>, vector<2x256xf32>
    tpu.vector_store %arg2[%c0_18, %c0_19], %73 {strides = array<i32>} : memref<2x256xf32, #tpu.memory_space<vmem>>, vector<2x256xf32>,
    return
  }
  func.func @transform_0(%arg0: i32) -> (i32, i32) {
    %c0_i32 = arith.constant 0 : i32
    %c0_i32_0 = arith.constant 0 : i32
    return %c0_i32, %arg0 : i32, i32
  }
  func.func @transform_1(%arg0: i32) -> (i32, i32) {
    %c0_i32 = arith.constant 0 : i32
    %c0_i32_0 = arith.constant 0 : i32
    return %c0_i32, %arg0 : i32, i32
  }
}

</mosaic_0001>

<bundles_post_ra>
// kernel: tpu_custom_call.1
= control target key start
LH: loop header
LB: loop body
LE: loop exit
PB: predicated region body
PF: predicated region fallthrough
CT: control target
= control target key end

     0   :  { %6 = vsyncpa [#allocation3], 0  ;;  %s906_s0 = inlined_call_operand.hbm [shape: f32[4,512], index: 0, kind: input, shape index: {}]   ;;  %s907_s1 = inlined_call_operand.hbm [shape: f32[2,512], index: 1, kind: output, shape index: {}]  }
   0x1   :  { %8 = vsyncpa [#allocation3 + $0x1], 0 }
   0x2   :  { %9 = vsyncpa [#allocation4], 0 }
   0x3   :  { %11 = vsyncpa [#allocation4 + $0x1], 0  ;;  %s723_s6 = smov 0   ;;  %s725_s7 = smov 0  }
   0x4   :  { %s727_s8 = smov 0   ;;  %s729_s9 = smov 0  }
   0x5 LB: > { %s744_s10 = sadd.s32 4294967295, %s703_s9   ;;  %s521_s11 = sadd.s32 4294967294, %s703_s9   ;;  %s703_s9 = sphi %s729_s9, %s922_s9   ;;  %s699_s8 = sphi %s727_s8, %s921_s8   ;;  %s695_s7 = sphi %s725_s7, %s920_s7   ;;  %s691_s6 = sphi %s723_s6, %s919_s6  }
   0x6   : > { %s748_s12 = sadd.s32 1, %s703_s9   ;;  %s24_s13 = sadd.s32 1, %s699_s8 }
   0x7   : > { %s21_s14 = ssub.s32 %s703_s9, %s748_s12  ;;  %p31_p0 = scmp.ne.s32.totalorder %s699_s8, %s695_s7 }
   0x8   : > { %p22_p1 = scmp.eq.s32.totalorder %s21_s14, 0  ;;  %p32_p2 = scmp.eq.s32.totalorder %s703_s9, 0 }
   0x9   : > { %p37_p3 = scmp.ne.s32.totalorder %s695_s7, %s691_s6  ;;  %p38_p4 = scmp.eq.s32.totalorder %s744_s10, 0 }
   0xa   : > { %s760_s15 = scalar_select %p22_p1, %s699_s8, %s24_s13  }
   0xb   : > { %p762_p5 = por %p32_p2, %p31_p0  ;;  %p766_p6 = por %p38_p4, %p37_p3 }
   0xc   : > { %p61_p7 = scmp.eq.s32.totalorder %s744_s10, 1  ;;  %p67_p8 = scmp.eq.s32.totalorder %s521_s11, 1 }
   0xd   : > { %p563_p10 = scmp.lt.s32.totalorder %s703_s9, 2  ;;  %s87_s20 = sand.u32 1, %s699_s8  }
   0xe   : > { %p773_p11 = por %p61_p7, %p31_p0  ;;  %p777_p12 = por %p67_p8, %p37_p3 }
   0xf   : > { %s545_s21 = sshll.u32 %s703_s9, 7  ;;  %s524_s22 = sshll.u32 %s87_s20, 3 }
  0x10   : > { %s911_s18 = scalar_select %p773_p11, 1, 0 }
  0x11   : > { %s912_s19 = scalar_select %p777_p12, 1, 0 }
  0x12   : > { %s786_s25 = scalar_lea.hbm %s906_s0, %s545_s21  ;;  %s91_s26 = scalar_lea.vmem [#allocation2], %s524_s22 }
  0x13   : > { %s99_s27 = sshll.u32 %s91_s26, 4  ;;  %p790_p13 = pnand %p563_p10, %p762_p5  ;;  %s794_s27 = int_to_ptr.vmem [resolvable:$true] %s99_s27 }
  0x14   : > { %s88_s29 = scalar_lea.sflag [#allocation3], %s87_s20  ;;  %s607_s30 = scalar_lea.hbm %s786_s25, 128 }
  0x15   : > { %p608_p2 = scmp.ne.s32.totalorder %s786_s25, %s607_s30  ;;  %p609_p3 = pneg %p790_p13 }
  0x16   : > { %s612_s4 = scalar_lea.hbm %s906_s0, 256  ;;  %p613_p5 = scmp.lt.u32.totalorder %s786_s25, %s906_s0 }
  0x17   : > { %p610_p4 = pnand %p609_p3, %p608_p2  ;;  %p614_p8 = scmp.lt.u32.totalorder %s612_s4, %s607_s30 }
  0x18   : > { %p616_p9 = scmp.lt.u32.totalorder %s607_s30, %s786_s25 }
  0x19   : > { %p611_p7 = pneg %p610_p4  ;;  %p615_p10 = por %p614_p8, %p613_p5 }
  0x1b   : > { %p617_p0 = por %p616_p9, %p615_p10 }
  0x1d   : > { %p618_p1 = pnand %p617_p0, %p611_p7 }
  0x1f   : > { %621 = shalt.err (!%p618_p1)
}
  0x20   : > { %s622_s13 = scalar_lea.vmem %s794_s27, 128  ;;  %s705_s14 = smov [#allocation2]  }
  0x21   : > { %p623_p2 = scmp.ne.s32.totalorder %s794_s27, %s622_s13  ;;  %s627_s16 = sshll.u32 %s705_s14, 4  ;;  %s628_s16 = int_to_ptr.vmem [resolvable:$false] %s627_s16 }
  0x22   : > { %s629_s20 = scalar_lea.vmem %s628_s16, 256  ;;  %p630_p11 = scmp.lt.s32.totalorder %s794_s27, %s628_s16 }
  0x23   : > { %p625_p4 = pnand %p623_p2, %p609_p3  ;;  %p631_p5 = scmp.lt.s32.totalorder %s629_s20, %s622_s13 }
  0x25   : > { %p626_p12 = pneg %p625_p4  ;;  %p632_p8 = por %p631_p5, %p630_p11 }
  0x27   : > { %p633_p9 = pnand %p632_p8, %p626_p12 }
  0x29   : > { %636 = shalt.err (!%p633_p9)
}
  0x2a   : > { %558 = dma.hbm_to_vmem [thread:$0]  (!%p790_p13), %s786_s25, 128, %s794_s27, %s88_s29  }
  0x2b   : > { %p914_p0 = scmp.lt.s32.totalorder %s703_s9, 3  ;;  %p915_p1 = scmp.ge.s32.totalorder %s703_s9, 1 }
  0x2d   : > { %p105_p3 = pnand %p915_p1, %p914_p0 }
  0x2e   : > { %s828_s21 = sand.u32 (!%p105_p3), 1, %s695_s7  }
  0x2f   : > { %108 = sbr.rel (%p105_p3) target bundleno = 184 (0xb8), region = 24  ;;  %s528_s22 = sshll.u32 (!%p105_p3), %s828_s21, 3 }
  0x30   : > { %s111_s23 = scalar_lea.sflag (!%p105_p3), [#allocation3], %s828_s21  ;;  %s114_s24 = scalar_lea.vmem (!%p105_p3), [#allocation2], %s528_s22 }
  0x36   : > { %682 = dma.done.wait (%p766_p6), %s111_s23, 128  }
  0x37   : > { %684 = vsyncadd (%p766_p6), %s111_s23, 4294967168  ;;  %v135_v0 = vld [vmem:[%s114_s24] sm:$0xff]  ;;  %v706_v15 = vmov 683565275   ;;  %v707_v17 = vmov 2475754826  }
  0x38   : > { %v530_v1 = vrot.slane %v135_v0, 10  ;;  %v708_v19 = vmov 2131351028   ;;  %v709_v21 = vmov 2102212464   ;;  %s529_s17 = sshll.u32 %s828_s21, 2 }
  0x39   : > { %v710_v23 = vmov 920167782   ;;  %v711_v30 = vmov 1326507024   ;;  %s132_s25 = scalar_lea.vmem [#allocation5], %s529_s17  ;;  %s546_s27 = sshll.u32 %s744_s10, 6 }
  0x3a   : > { %v140_v2 = vadd.f32 %v530_v1, %v135_v0  ;;  %s451_s26 = sshll.u32 %s132_s25, 4  ;;  %s864_s30 = scalar_lea.hbm %s907_s1, %s546_s27  ;;  %s859_s26 = int_to_ptr.vmem [resolvable:$true] %s451_s26 }
  0x3b   : > { %s437_s2 = scalar_lea.sflag [#allocation4], %s828_s21  ;;  %s637_s3 = scalar_lea.vmem %s859_s26, 64 }
  0x3c   : > { %v836_v3 = vmul.f32 1.5707964, %v140_v2  ;;  %p638_p6 = scmp.ne.s32.totalorder %s859_s26, %s637_s3  ;;  %p916_p11 = scmp.ne.s32.totalorder %s911_s18, 0 }
  0x3d   : > { %s712_s10 = smov [#allocation5]  }
  0x3e   : > { %v145_v4 = vand.u32 2139095040, %v836_v3  ;;  %v142_v6 = vand.u32 2147483647, %v836_v3  ;;  %vm144_vm7 = vcmp.lt.s32.totalorder %v836_v3, 0  ;;  %vm234_vm15 = vweird.f32 %v836_v3  ;;  %p639_p12 = pnand %p638_p6, %p916_p11  ;;  %s641_s4 = sshll.u32 %s712_s10, 4  ;;  %s642_s4 = int_to_ptr.vmem [resolvable:$false] %s641_s4 }
  0x3f   : > { %s643_s5 = scalar_lea.vmem %s642_s4, 128  ;;  %p644_p7 = scmp.lt.s32.totalorder %s859_s26, %s642_s4 }
  0x40   : > { %v146_v5 = vshrl.u32 %v145_v4, 23  ;;  %v149_v9 = vand.u32 8388607, %v142_v6  ;;  %vm143_vm8 = vcmp.le.f32.partialorder %v142_v6, 0.7853982  ;;  %p640_p13 = pneg %p639_p12  ;;  %p645_p10 = scmp.lt.s32.totalorder %s643_s5, %s637_s3 }
  0x42   : > { %v531_v7 = vadd.s32 4294967169, %v146_v5  ;;  %v150_v12 = vor.u32 8388608, %v149_v9  ;;  %p646_p2 = por %p645_p10, %p644_p7 }
  0x44   : > { %v152_v8 = vadd.s32 1, %v531_v7  ;;  %v190_v32 = vshll.u32 %v150_v12, 8  ;;  %p647_p4 = pnand %p646_p2, %p640_p13 }
  0x46   : > { %vm153_vm0 = vcmp.gt.s32.totalorder %v152_v8, 0 }
  0x47   : > { %v154_v10 = vsel %vm153_vm0, %v152_v8, 0  ;;  %vm421_vm0 = vcmask 1040384  }
  0x48   : > { %v156_v11 = vand.u32 31, %v154_v10  ;;  %v155_v13 = vshrl.u32 %v154_v10, 5 }
  0x4a   : > { %v157_v14 = vsub.s32 32, %v156_v11  ;;  %v159_v16 = vshll.u32 %v706_v15, %v156_v11  ;;  %v162_v18 = vshll.u32 %v707_v17, %v156_v11  ;;  %v165_v20 = vshll.u32 %v708_v19, %v156_v11 }
  0x4b   : > { %v168_v22 = vshll.u32 %v709_v21, %v156_v11  ;;  %v171_v24 = vshll.u32 %v710_v23, %v156_v11  ;;  %vm174_vm1 = vcmp.lt.s32.totalorder %v155_v13, 1  ;;  %vm177_vm2 = vcmp.lt.s32.totalorder %v155_v13, 4 }
  0x4c   : > { %v158_v25 = vshrl.u32 %v706_v15, %v157_v14  ;;  %v160_v26 = vshrl.u32 %v707_v17, %v157_v14  ;;  %v163_v27 = vshrl.u32 %v708_v19, %v157_v14  ;;  %v166_v28 = vshrl.u32 %v709_v21, %v157_v14 }
  0x4d   : > { %v169_v29 = vshrl.u32 %v710_v23, %v157_v14  ;;  %v172_v31 = vshrl.u32 %v711_v30, %v157_v14  ;;  %vm175_vm3 = vcmp.lt.s32.totalorder %v155_v13, 2  ;;  %vm176_vm4 = vcmp.lt.s32.totalorder %v155_v13, 3 }
  0x4e   : > { %v161_v33 = vor.u32 %v160_v26, %v159_v16  ;;  %v164_v34 = vor.u32 %v163_v27, %v162_v18  ;;  %v167_v35 = vor.u32 %v166_v28, %v165_v20 }
  0x4f   : > { %v170_v36 = vor.u32 %v169_v29, %v168_v22  ;;  %v173_v37 = vor.u32 %v172_v31, %v171_v24 }
  0x50   : > { %v178_v38 = vsel %vm174_vm1, %v158_v25, %v161_v33  ;;  %v179_v39 = vsel %vm177_vm2, %v167_v35, 2102212464  ;;  %v182_v40 = vsel %vm174_vm1, %v161_v33, %v164_v34  ;;  %v186_v41 = vsel %vm174_vm1, %v164_v34, %v167_v35 }
  0x51   : > { %v180_v42 = vsel %vm176_vm4, %v164_v34, %v179_v39  ;;  %v183_v43 = vsel %vm177_vm2, %v170_v36, 920167782  ;;  %v187_v44 = vsel %vm177_vm2, %v173_v37, 1326507024 }
  0x52   : > { %v184_v45 = vsel %vm176_vm4, %v167_v35, %v183_v43  ;;  %v188_v46 = vsel %vm176_vm4, %v170_v36, %v187_v44  ;;  %v181_v47 = vsel %vm175_vm3, %v178_v38, %v180_v42 }
  0x53   : > { %v185_v48 = vsel %vm175_vm3, %v182_v40, %v184_v45  ;;  %v189_v49 = vsel %vm175_vm3, %v186_v41, %v188_v46  ;;  %v197_v54 = vmul.u32 %v190_v32, %v181_v47 }
  0x54   : > { %v842_v50 = vmul.u32.u64.low %v190_v32, %v189_v49  ;;  %v843_v51 = vmul.u32.u64.high %v190_v32, %v189_v49, %v842_v50  ;;  %v845_v52 = vmul.u32.u64.low %v190_v32, %v185_v48  ;;  %v846_v53 = vmul.u32.u64.high %v190_v32, %v185_v48, %v845_v52 }
  0x56   : > { %vm199_vm5 = vc.u32 %v843_v51, %v845_v52  ;;  %v200_v55 = vadd.s32 1, %v846_v53  ;;  %v198_v2 = vadd.s32 %v845_v52, %v843_v51 }
  0x58   : > { %v201_v56 = vsel %vm199_vm5, %v200_v55, %v846_v53 }
  0x59   : > { %v202_v57 = vadd.s32 %v201_v56, %v197_v54 }
  0x5b   : > { %v203_v58 = vadd.s32 536870912, %v202_v57 }
  0x5d   : > { %v204_v59 = vshrl.u32 %v203_v58, 30 }
  0x5f   : > { %v205_v60 = vshll.u32 %v204_v59, 30  ;;  %v228_v16 = vsub.s32 4, %v204_v59 }
  0x61   : > { %v206_v61 = vsub.s32 %v202_v57, %v205_v60  ;;  %v229_v19 = vsel %vm144_vm7, %v228_v16, %v204_v59 }
  0x62   : > { %v231_v22 = vsel %vm143_vm8, 0, %v229_v19 }
  0x63   : > { %v208_v62 = vsub.s32 0, %v206_v61  ;;  %v338_v23 = vadd.s32 3, %v231_v22  ;;  %v235_v24 = vand.u32 3, %v231_v22 }
  0x65   : > { %v532_v63 = vmin.u32 %v208_v62, %v206_v61  ;;  %v339_v25 = vand.u32 3, %v338_v23  ;;  %vm240_vm9 = vcmp.eq.s32.totalorder %v235_v24, 2  ;;  %vm237_vm11 = vcmp.eq.s32.totalorder %v235_v24, 0 }
  0x66   : > { %vm236_vm13 = vcmp.lt.s32.totalorder %v235_v24, 2 }
  0x67   : > { %v210_v0 = vclz %v532_v63  ;;  %vm344_vm10 = vcmp.eq.s32.totalorder %v339_v25, 2  ;;  %vm341_vm12 = vcmp.eq.s32.totalorder %v339_v25, 0  ;;  %vm340_vm14 = vcmp.lt.s32.totalorder %v339_v25, 2 }
  0x69   : > { %v533_v1 = vadd.s32 4294967294, %v210_v0  ;;  %v400_v0 = vlaneseq }
  0x6b   : > { %vm534_vm6 = vcmp.lt.s32.totalorder %v533_v1, 0 }
  0x6c   : > { %v213_v4 = vsel %vm534_vm6, 0, %v533_v1 }
  0x6d   : > { %v214_v5 = vsub.s32 32, %v213_v4  ;;  %v215_v7 = vshll.u32 %v206_v61, %v213_v4  ;;  %v218_v8 = vsub.s32 4294967266, %v213_v4 }
  0x6f   : > { %v216_v9 = vshrl.u32 %v198_v2, %v214_v5  ;;  %v219_v10 = vadd.s32 127, %v218_v8 }
  0x71   : > { %v217_v11 = vor.u32 %v216_v9, %v215_v7  ;;  %v220_v12 = vshll.u32 %v219_v10, 23 }
  0x73   : > { %v221_v13 = vor.u32 4788187, %v220_v12  ;;  %v224_v14 = vcvt.s32.f32 %v217_v11  ;;  %v401_v12 = vshrl.u32 %v400_v0, 7 }
  0x75   : > { %v222_v15 = vand.u32 2147483647, %v221_v13 }
  0x77   : > { %v225_v17 = vmul.f32 %v224_v14, %v222_v15 }
  0x79   : > { %v226_v18 = vxor.u32 2147483648, %v225_v17 }
  0x7b   : > { %v227_v20 = vsel %vm144_vm7, %v226_v18, %v225_v17 }
  0x7c   : > { %v230_v21 = vsel %vm143_vm8, %v836_v3, %v227_v20  ;;  %v402_v20 = vsub.s32 0, %v401_v12 }
  0x7d   : > { %603 = vcosq.f32 %v230_v21 }
  0x7e   : > { %605 = vsinq.f32 %v230_v21  ;;  %v406_v21 = vsub.s32 4, %v401_v12 }
  0x87   : > { %v604_v26 = vpop.eup %603 }
  0x88   : > { %v606_v27 = vpop.eup %605  ;;  %v241_v28 = vxor.u32 2147483648, %v604_v26 }
  0x89   : > { %v238_v6 = vxor.u32 2147483648, %v606_v27 }
  0x8a   : > { %v242_v29 = vsel %vm240_vm9, %v241_v28, %v606_v27  ;;  %v346_v30 = vsel %vm344_vm10, %v241_v28, %v606_v27 }
  0x8b   : > { %v239_v31 = vsel %vm237_vm11, %v604_v26, %v238_v6  ;;  %v343_v32 = vsel %vm341_vm12, %v604_v26, %v238_v6 }
  0x8c   : > { %v243_v33 = vsel %vm236_vm13, %v239_v31, %v242_v29  ;;  %v347_v34 = vsel %vm340_vm14, %v343_v32, %v346_v30 }
  0x8d   : > { %v244_v35 = vsel %vm234_vm15, nan, %v243_v33  ;;  %v348_v36 = vsel %vm234_vm15, nan, %v347_v34 }
  0x8e   : > { %v350_v37 = vrot.slane %v244_v35, 5  ;;  %v356_v38 = vrot.slane %v348_v36, 5 }
  0x90   : > { %v351_v39 = vrot.slane %v350_v37, 4  ;;  %v357_v40 = vrot.slane %v356_v38, 4 }
  0x92   : > { %v353_v41 = vmul.f32 %v351_v39, %v244_v35  ;;  %v354_v42 = vmul.f32 %v351_v39, %v348_v36  ;;  %v359_v43 = vmul.f32 %v357_v40, %v244_v35  ;;  %v360_v44 = vmul.f32 %v357_v40, %v348_v36 }
  0x94   : > { %v361_v45 = vmul.f32 -0.61349195, %v353_v41  ;;  %v362_v46 = vmul.f32 -0.13343278, %v354_v42  ;;  %v364_v47 = vmul.f32 0.65491706, %v359_v43 }
  0x95   : > { %v369_v3 = vmul.f32 0.33039516, %v353_v41  ;;  %v370_v48 = vmul.f32 -0.9336169, %v354_v42  ;;  %v366_v50 = vmul.f32 0.42060316, %v360_v44 }
  0x96   : > { %v363_v49 = vadd.f32 %v362_v46, %v361_v45  ;;  %v372_v51 = vmul.f32 0.1360705, %v359_v43  ;;  %v379_v52 = vmul.f32 -0.6373221, %v353_v41  ;;  %v374_v54 = vmul.f32 -0.02614158, %v360_v44 }
  0x97   : > { %v371_v53 = vadd.f32 %v370_v48, %v369_v3  ;;  %v380_v55 = vmul.f32 -0.23315738, %v354_v42  ;;  %v382_v56 = vmul.f32 -0.18863674, %v359_v43  ;;  %v389_v58 = vmul.f32 -0.32907024, %v353_v41 }
  0x98   : > { %v365_v57 = vadd.f32 %v364_v47, %v363_v49  ;;  %v390_v59 = vmul.f32 -0.23705032, %v354_v42  ;;  %v392_v60 = vmul.f32 -0.71901643, %v359_v43  ;;  %v384_v63 = vmul.f32 -0.7098411, %v360_v44 }
  0x99   : > { %v373_v61 = vadd.f32 %v372_v51, %v371_v53  ;;  %v381_v62 = vadd.f32 %v380_v55, %v379_v52  ;;  %v394_v4 = vmul.f32 0.5643893, %v360_v44 }
  0x9a   : > { %v367_v1 = vadd.f32 %v366_v50, %v365_v57  ;;  %v391_v2 = vadd.f32 %v390_v59, %v389_v58 }
  0x9b   : > { %v375_v5 = vadd.f32 %v374_v54, %v373_v61  ;;  %v383_v7 = vadd.f32 %v382_v56, %v381_v62 }
  0x9c   : > { %v368_v8 = vmul.f32 %v367_v1, %v367_v1  ;;  %v393_v9 = vadd.f32 %v392_v60, %v391_v2 }
  0x9d   : > { %v376_v10 = vmul.f32 %v375_v5, %v375_v5  ;;  %v385_v11 = vadd.f32 %v384_v63, %v383_v7 }
  0x9e   : > { %v395_v13 = vadd.f32 %v394_v4, %v393_v9 }
  0x9f   : > { %v377_v14 = vsub.f32 %v368_v8, %v376_v10  ;;  %v378_v15 = vadd.f32 %v376_v10, %v368_v8  ;;  %v386_v16 = vmul.f32 %v385_v11, %v385_v11 }
  0xa0   : > { %v396_v17 = vmul.f32 %v395_v13, %v395_v13 }
  0xa1   : > { %v387_v18 = vadd.f32 %v386_v16, %v377_v14  ;;  %v388_v19 = vsub.f32 %v378_v15, %v386_v16 }
  0xa3   : > { %v397_v22 = vsub.f32 %v387_v18, %v396_v17  ;;  %v398_v23 = vsub.f32 %v388_v19, %v396_v17 }
  0xa5   : > { %v403_v24 = vrot.slane %v397_v22, %v402_v20  ;;  %v407_v25 = vrot.slane %v397_v22, %v406_v21  ;;  %v414_v26 = vrot.slane %v398_v23, %v402_v20  ;;  %v418_v27 = vrot.slane %v398_v23, %v406_v21 }
  0xa7   : > { %v422_v28 = vsel %vm421_vm0, %v403_v24, %v414_v26  ;;  %v423_v6 = vsel %vm421_vm0, %v407_v25, %v418_v27 }
  0xa8   : > { %v426_v29 = vcombine.low %v422_v28, %v423_v6 }
  0xaa   : > { %539 = vst.sshfl [vmem:[%s132_s25] sm:$0x33 pattern:$0x76325410] %v426_v29 }
  0xab   : > { %650 = shalt.err (!%p647_p4)
}
  0xac   : > { %s651_s11 = scalar_lea.hbm %s864_s30, 64  ;;  %s655_s16 = scalar_lea.hbm %s907_s1, 128 }
  0xad   : > { %p652_p5 = scmp.ne.s32.totalorder %s864_s30, %s651_s11  ;;  %p656_p0 = scmp.lt.u32.totalorder %s864_s30, %s907_s1 }
  0xae   : > { %p657_p1 = scmp.lt.u32.totalorder %s655_s16, %s651_s11  ;;  %p659_p6 = scmp.lt.u32.totalorder %s651_s11, %s864_s30 }
  0xaf   : > { %p653_p8 = pnand %p652_p5, %p916_p11 }
  0xb0   : > { %p658_p3 = por %p657_p1, %p656_p0 }
  0xb1   : > { %p654_p9 = pneg %p653_p8 }
  0xb2   : > { %p660_p12 = por %p659_p6, %p658_p3 }
  0xb4   : > { %p661_p13 = pnand %p660_p12, %p654_p9 }
  0xb6   : > { %664 = shalt.err (!%p661_p13)
}
  0xb7   : > { %553 = dma.vmem_to_hbm [thread:$0]  (%p916_p11), %s859_s26, 64, %s864_s30, %s437_s2  }
  0xb8 PF: > { %s463_s22 = sand.u32 1, %s691_s6   ;;  %p917_p7 = scmp.ne.s32.totalorder %s912_s19, 0 }
  0xb9   : > { %p918_p10 = scmp.ge.s32.totalorder %s703_s9, 2  ;;  %s464_s23 = scalar_lea.sflag [#allocation4], %s463_s22 }
  0xbb   : > { %p560_p2 = pnand %p918_p10, %p917_p7 }
  0xbd   : > { %686 = dma.done.wait (!%p560_p2), %s464_s23, 64  }
  0xbe   : > { %688 = vsyncadd (!%p560_p2), %s464_s23, 4294967232  ;;  %p14_p4 = scmp.ge.s32.totalorder %s748_s12, 4   ;;  %s919_s6 = smov %s695_s7 }
  0xbf   : > { %s920_s7 = smov %s699_s8  ;;  %s921_s8 = smov %s760_s15 }
  0xc0   : > { %s922_s9 = smov %s748_s12  ;;  %16 = sbr.rel (!%p14_p4) target bundleno = 5 (0x5), region = 69 }
  0xc7   :  { %469 = vsyncpa [#allocation3], 1 }
  0xc8   :  { %471 = vsyncpa [#allocation3 + $0x1], 1 }
  0xc9   :  { %472 = vsyncpa [#allocation4], 1 }
  0xca   :  { %474 = vsyncpa [#allocation4 + $0x1], 1 }

</bundles_post_ra>
